<compile_context>
chip_gen: v7x
topology: tpu7x:2x2x1
jax: 0.10.0
libtpu: 0.0.40
codegen_flags: <defaults>
</compile_context>

<pallas_src>
import numpy as np
import jax
import jax.numpy as jnp
from jax.experimental import pallas as pl
from jax.experimental.pallas import tpu as pltpu

LANE = 128


# --------------------------------------------------------------------------- #
# Fixed sinusoidal signal (setup, plain JAX — mirrors the PyTorch helper)
# --------------------------------------------------------------------------- #
def positional_signal(hidden_size, length, min_timescale=1.0, max_timescale=10000.0):
    """Returns (1, length, hidden_size) float32 sinusoidal positional signal."""
    if hidden_size % 2 != 0:
        raise ValueError("hidden_size must be divisible by 2")
    position = jnp.arange(0, length, dtype=jnp.float32)                     # (L,)
    num_timescales = hidden_size // 2
    denom = max(num_timescales - 1, 1)                                      # guard H == 2
    log_timescale_increment = np.log(float(max_timescale) / float(min_timescale)) / denom
    inv_timescales = min_timescale * jnp.exp(
        jnp.arange(0, num_timescales, dtype=jnp.float32) * -log_timescale_increment
    )                                                                        # (H/2,)
    scaled_time = position[:, None] * inv_timescales[None, :]               # (L, H/2)
    signal = jnp.concatenate([jnp.sin(scaled_time), jnp.cos(scaled_time)], axis=1)
    return signal[None, :, :]                                               # (1, L, H)


# --------------------------------------------------------------------------- #
# Helpers
# --------------------------------------------------------------------------- #
def _cdiv(a, b):
    return (a + b - 1) // b


def _round_up(x, m):
    return _cdiv(x, m) * m


def _round_down(x, m):
    return max(m, (x // m) * m)


def _vmem_budget():
    """(per-input tile budget bytes, scoped vmem_limit_bytes) by TPU generation."""
    cap = 128 * 1024 * 1024
    try:
        info = pltpu.get_tpu_info()
        cap = int(getattr(info, "vmem_capacity_bytes", cap))
    except Exception:
        pass
    if cap <= 64 * 1024 * 1024:
        # v7x-class: 3.2 TB/s HBM wants big tiles, but only 64 MiB VMEM -> cap at 48 MiB
        return 4 * 1024 * 1024, 48 * 1024 * 1024
    # v5e / v6e: 128 MiB physical VMEM; raise the scoped limit explicitly
    return 8 * 1024 * 1024, 80 * 1024 * 1024


# --------------------------------------------------------------------------- #
# Pallas kernel: lane-dense broadcast add
# --------------------------------------------------------------------------- #
def _pos_add_kernel(x_ref, sig_ref, o_ref):
    # x_ref : (row_block, col_block) in the input dtype
    # sig_ref: (1, col_block) in the output dtype (broadcast over rows)
    # o_ref : (row_block, col_block) in the promoted output dtype
    o_ref[...] = x_ref[...].astype(o_ref.dtype) + sig_ref[...]


def positional_encoding_layer(inputs, signal, add_pos=True, min_bytes_for_kernel=1 << 20):
    """inputs: (B, L, H); signal: (1, L, H) or (1, L*H). Returns inputs + signal."""
    if not add_pos:
        return signal

    B, L, H = inputs.shape
    W = L * H
    sig_flat = jnp.reshape(signal, (1, W))

    out_dtype = jnp.promote_types(inputs.dtype, sig_flat.dtype)
    in_item = jnp.dtype(inputs.dtype).itemsize
    out_item = jnp.dtype(out_dtype).itemsize

    # Tiny problems: XLA's fused broadcast add is already at roofline.
    if B * W * max(in_item, out_item) < min_bytes_for_kernel:
        return inputs + sig_flat.reshape(1, L, H)

    sig_flat = sig_flat.astype(out_dtype)

    # dtype-aware packed-sublane count (f32 -> 8, bf16 -> 16, int8/fp8 -> 32)
    SUB = max(8, 32 // min(in_item, out_item))
    tile_budget, vmem_limit = _vmem_budget()

    # column block: lane-dense multiple of 128, sized so a (SUB, col_block) tile fits
    max_cols = _round_down(tile_budget // (SUB * out_item), LANE)
    col_block = min(max_cols, _round_up(W, LANE))

    # row block: multiple of SUB, sized from the same VMEM budget
    rows_budget = _round_down(tile_budget // (col_block * out_item), SUB)
    row_block = min(rows_budget, _round_up(B, SUB))

    n_col = _cdiv(W, col_block)
    n_row = _cdiv(B, row_block)

    # Only manufacture a second grid step (for v7x's two TensorCores) when the
    # grid would otherwise collapse to one; shrinking tiles otherwise just
    # doubles per-step overhead on single-TC chips.
    if n_col * n_row < 2 and row_block > SUB:
        row_block = _round_down(_cdiv(row_block, 2), SUB)
        n_row = _cdiv(B, row_block)

    x2 = inputs.reshape(B, W)

    out2 = pl.pallas_call(
        _pos_add_kernel,
        out_shape=jax.ShapeDtypeStruct((B, W), out_dtype),
        # rows innermost: the shared signal block index is constant along the
        # inner axis, so it stays VMEM-resident per column stripe.
        grid=(n_col, n_row),
        in_specs=[
            pl.BlockSpec((row_block, col_block), lambda j, i: (i, j)),  # input rows
            pl.BlockSpec((1, col_block), lambda j, i: (0, j)),          # shared signal row
        ],
        out_specs=pl.BlockSpec((row_block, col_block), lambda j, i: (i, j)),
        compiler_params=pltpu.CompilerParams(
            dimension_semantics=("parallel", "parallel"),
            vmem_limit_bytes=vmem_limit,
        ),
    )(x2, sig_flat)

    return out2.reshape(B, L, H)


# --------------------------------------------------------------------------- #
# Demo / correctness check
# --------------------------------------------------------------------------- #
if __name__ == "__main__":
    key = jax.random.PRNGKey(0)

    # Module config: input_length=fields, in_shape=hidden_units, pos_type='fixed', add_pos=True
    batch, fields, hidden = 2, 8, 32
    x = jax.random.normal(key, (batch, fields, hidden), dtype=jnp.float32)
    sig = positional_signal(hidden, fields, min_timescale=1.0, max_timescale=10000.0)

    out = jax.block_until_ready(
        positional_encoding_layer(x, sig, min_bytes_for_kernel=0)  # force kernel path
    )
    ref = x + sig  # broadcast over batch, same as signal.repeat(bz, 1, 1) + add
    np.testing.assert_allclose(np.asarray(out), np.asarray(ref), rtol=1e-6, atol=1e-6)

    # ragged columns (L*H % 128 != 0) and row tiling (B > 8) without any padding
    k2, k3 = jax.random.split(key)
    b2, f2, h2 = 16, 8, 20
    x2 = jax.random.normal(k2, (b2, f2, h2), dtype=jnp.float32)
    sig2 = positional_signal(h2, f2)
    out2 = jax.block_until_ready(
        positional_encoding_layer(x2, sig2, min_bytes_for_kernel=0)
    )
    np.testing.assert_allclose(np.asarray(out2), np.asarray(x2 + sig2), rtol=1e-6, atol=1e-6)

    # low-precision input: bf16 input + f32 signal promotes to f32 (PyTorch semantics)
    b3, f3, h3 = 4, 8, 64
    x3 = jax.random.normal(k3, (b3, f3, h3), dtype=jnp.bfloat16)
    sig3 = positional_signal(h3, f3)
    out3 = jax.block_until_ready(
        positional_encoding_layer(x3, sig3, min_bytes_for_kernel=0)
    )
    assert out3.dtype == jnp.float32
    np.testing.assert_allclose(
        np.asarray(out3), np.asarray(x3.astype(jnp.float32) + sig3), rtol=1e-6, atol=1e-6
    )

    print("KERNEL_OK")
</pallas_src>

<mosaic_0001>
module attributes {stable_mosaic.version = 11 : i64} {
  func.func @_pos_add_kernel(%arg0: i32, %arg1: i32, %arg2: memref<8x256xf32, #tpu.memory_space<vmem>>, %arg3: memref<1x256xf32, #tpu.memory_space<vmem>>, %arg4: memref<8x256xf32, #tpu.memory_space<vmem>>) attributes {dimension_semantics = [#tpu.dimension_semantics<parallel>, #tpu.dimension_semantics<parallel>], iteration_bounds = array<i64: 1, 1>, scalar_prefetch = 0 : i64, scratch_operands = 0 : i64, tpu.core_type = #tpu.core_type<tc>, window_params = [{transform_indices = @transform_0, window_bounds = array<i64: 8, 256>}, {transform_indices = @transform_1, window_bounds = array<i64: 1, 256>}, {transform_indices = @transform_2, window_bounds = array<i64: 8, 256>}]} {
    %c0 = arith.constant 0 : index
    %c0_0 = arith.constant 0 : index
    %0 = vector.load %arg2[%c0, %c0_0] : memref<8x256xf32, #tpu.memory_space<vmem>>, vector<8x256xf32>
    %c0_1 = arith.constant 0 : index
    %c0_2 = arith.constant 0 : index
    %1 = vector.load %arg3[%c0_1, %c0_2] : memref<1x256xf32, #tpu.memory_space<vmem>>, vector<1x256xf32>
    %2 = vector.broadcast %1 : vector<1x256xf32> to vector<8x256xf32>
    %3 = arith.addf %0, %2 : vector<8x256xf32>
    %c0_3 = arith.constant 0 : index
    %c0_4 = arith.constant 0 : index
    %4 = vector.load %arg4[%c0_3, %c0_4] : memref<8x256xf32, #tpu.memory_space<vmem>>, vector<8x256xf32>
    tpu.vector_store %arg4[%c0_3, %c0_4], %3 {strides = array<i32>} : memref<8x256xf32, #tpu.memory_space<vmem>>, vector<8x256xf32>,
    return
  }
  func.func @transform_0(%arg0: i32, %arg1: i32) -> (i32, i32) {
    %c0_i32 = arith.constant 0 : i32
    return %arg1, %arg0 : i32, i32
  }
  func.func @transform_1(%arg0: i32, %arg1: i32) -> (i32, i32) {
    %c0_i32 = arith.constant 0 : i32
    %c0_i32_0 = arith.constant 0 : i32
    return %c0_i32, %arg0 : i32, i32
  }
  func.func @transform_2(%arg0: i32, %arg1: i32) -> (i32, i32) {
    %c0_i32 = arith.constant 0 : i32
    return %arg1, %arg0 : i32, i32
  }
}

</mosaic_0001>

<bundles_post_ra>
// kernel: tpu_custom_call.1
= control target key start
LH: loop header
LB: loop body
LE: loop exit
PB: predicated region body
PF: predicated region fallthrough
CT: control target
= control target key end

     0   :  { %7 = vsyncpa [#allocation3], 0  ;;  %s241_s0 = inlined_call_operand.hbm [shape: f32[2,256], index: 0, kind: input, shape index: {}]   ;;  %s242_s1 = inlined_call_operand.hbm [shape: f32[1,256], index: 1, kind: input, shape index: {}]   ;;  %s243_s2 = inlined_call_operand.hbm [shape: f32[2,256], index: 2, kind: output, shape index: {}]  }
   0x1   :  { %8 = vsyncpa [#allocation6], 0 }
   0x2   :  { %9 = vsyncpa [#allocation4], 0 }
   0x3   :  { %14 = vsyncadd [#allocation3], 192  ;;  %s178_s9 = smov [#allocation2]   ;;  %s106_s13 = scalar_lea.hbm %s241_s0, 64 }
   0x4   :  { %s15_s10 = sshll.u32 %s178_s9, 4  ;;  %p107_p0 = scmp.ne.s32.totalorder %s241_s0, %s106_s13  ;;  %s16_s10 = int_to_ptr.vmem [resolvable:$true] %s15_s10 }
   0x5   :  { %p110_p1 = scmp.lt.u32.totalorder %s106_s13, %s241_s0 }
   0x7   :  { %p112_p2 = pnand %p110_p1, %p107_p0 }
   0x9   :  { %115 = shalt.err (!%p112_p2)
}
   0xa   :  { %s116_s18 = scalar_lea.vmem %s16_s10, 64  ;;  %s120_s19 = scalar_lea.vmem %s16_s10, 256 }
   0xb   :  { %p117_p3 = scmp.ne.s32.totalorder %s16_s10, %s116_s18  ;;  %p121_p4 = scmp.lt.s32.totalorder %s16_s10, %s16_s10 }
   0xc   :  { %p122_p5 = scmp.lt.s32.totalorder %s120_s19, %s116_s18 }
   0xe   :  { %p123_p6 = por %p122_p5, %p121_p4 }
  0x10   :  { %p124_p7 = pnand %p123_p6, %p117_p3 }
  0x12   :  { %127 = shalt.err (!%p124_p7)
}
  0x13   :  { %s179_s20 = smov 64   ;;  %s180_s21 = smov 4  }
  0x14   :  { %21 = dma.hbm_to_vmem [thread:$0]  %s241_s0, 64, %s16_s10, [#allocation3], %s179_s20, %s179_s20, %s180_s21  }
  0x15   :  { %s181_s24 = smov [#allocation5]   ;;  %s128_s28 = scalar_lea.hbm %s242_s1, 32 }
  0x16   :  { %s28_s25 = sshll.u32 %s181_s24, 4  ;;  %p129_p8 = scmp.ne.s32.totalorder %s242_s1, %s128_s28  ;;  %s29_s25 = int_to_ptr.vmem [resolvable:$true] %s28_s25 }
  0x17   :  { %p132_p9 = scmp.lt.u32.totalorder %s128_s28, %s242_s1 }
  0x19   :  { %p134_p10 = pnand %p132_p9, %p129_p8 }
  0x1b   :  { %137 = shalt.err (!%p134_p10)
}
  0x1c   :  { %s138_s5 = scalar_lea.vmem %s29_s25, 32  ;;  %p143_p12 = scmp.lt.s32.totalorder %s29_s25, %s29_s25 }
  0x1d   :  { %p139_p11 = scmp.ne.s32.totalorder %s29_s25, %s138_s5  ;;  %p144_p13 = scmp.lt.s32.totalorder %s138_s5, %s138_s5 }
  0x1f   :  { %p145_p0 = por %p144_p13, %p143_p12 }
  0x21   :  { %p146_p1 = pnand %p145_p0, %p139_p11 }
  0x23   :  { %149 = shalt.err (!%p146_p1)
}
  0x24   :  { %31 = dma.hbm_to_vmem [thread:$0]  %s242_s1, 32, %s29_s25, [#allocation6]  }
  0x25   :  { %172 = dma.done.wait [#allocation3], 256  }
  0x26   :  { %173 = vsyncadd [#allocation3], 4294967040 }
  0x27   :  { %174 = dma.done.wait [#allocation6], 32  }
  0x28   :  { %175 = vsyncadd [#allocation6], 4294967264  ;;  %v44_v0 = vlaneseq  ;;  %v182_v1 = vmov 1983009808   ;;  %v42_v7 = vld [vmem:[#allocation5] sm:$0x3] }
  0x29   :  { %v55_v2 = vunpack.c.l.s4 %v182_v1  ;;  %v38_v13 = vld [vmem:[#allocation2] sm:$0xf]  ;;  %v40_v14 = vld [vmem:[#allocation2 + $0x8] sm:$0xf]  ;;  %v39_v17 = vld [vmem:[#allocation2 + $0x4] sm:$0xf] }
  0x2a   :  { %v45_v3 = vshrl.u32 %v44_v0, 7  ;;  %v41_v18 = vld [vmem:[#allocation2 + $0xc] sm:$0xf] }
  0x2b   :  { %v56_v6 = vunpack.c.0.s8 %v55_v2 }
  0x2c   :  { %v46_v4 = vsub.s32 0, %v45_v3  ;;  %v50_v5 = vsub.s32 1, %v45_v3 }
  0x2d   :  { %v59_v10 = vsub.s32 %v56_v6, %v45_v3 }
  0x2e   :  { %v47_v8 = vrot.slane %v42_v7, %v46_v4  ;;  %v51_v9 = vrot.slane %v42_v7, %v50_v5 }
  0x30   :  { %v52_v11 = vcombine.low %v47_v8, %v51_v9  ;;  %v53_v12 = vcombine.high %v47_v8, %v51_v9 }
  0x32   :  { %v60_v15 = vrot.slane %v52_v11, %v59_v10  ;;  %v67_v16 = vrot.slane %v53_v12, %v59_v10 }
  0x34   :  { %v74_v19 = vadd.f32 %v60_v15, %v38_v13  ;;  %v68_v20 = vcombine.high %v60_v15, %v60_v15  ;;  %v76_v21 = vadd.f32 %v67_v16, %v40_v14  ;;  %v69_v22 = vcombine.high %v67_v16, %v67_v16 }
  0x36   :  { %78 = vst [vmem:[#allocation7] sm:$0xf] %v74_v19  ;;  %v75_v23 = vadd.f32 %v68_v20, %v39_v17  ;;  %80 = vst [vmem:[#allocation7 + $0x8] sm:$0xf] %v76_v21  ;;  %v77_v24 = vadd.f32 %v69_v22, %v41_v18 }
  0x38   :  { %79 = vst [vmem:[#allocation7 + $0x4] sm:$0xf] %v75_v23  ;;  %81 = vst [vmem:[#allocation7 + $0xc] sm:$0xf] %v77_v24 }
  0x39   :  { %86 = vsyncadd [#allocation4], 192  ;;  %s183_s1 = smov [#allocation7]  }
  0x3a   :  { %s87_s7 = sshll.u32 %s183_s1, 4  ;;  %s88_s7 = int_to_ptr.vmem [resolvable:$true] %s87_s7 }
  0x3b   :  { %s150_s8 = scalar_lea.vmem %s88_s7, 64  ;;  %s154_s9 = scalar_lea.vmem %s88_s7, 256 }
  0x3c   :  { %p151_p2 = scmp.ne.s32.totalorder %s88_s7, %s150_s8  ;;  %p155_p3 = scmp.lt.s32.totalorder %s88_s7, %s88_s7 }
  0x3d   :  { %p156_p4 = scmp.lt.s32.totalorder %s154_s9, %s150_s8 }
  0x3f   :  { %p157_p5 = por %p156_p4, %p155_p3 }
  0x41   :  { %p158_p6 = pnand %p157_p5, %p151_p2 }
  0x43   :  { %161 = shalt.err (!%p158_p6)
}
  0x44   :  { %s162_s12 = scalar_lea.hbm %s243_s2, 64 }
  0x45   :  { %p163_p7 = scmp.ne.s32.totalorder %s243_s2, %s162_s12  ;;  %p166_p8 = scmp.lt.u32.totalorder %s162_s12, %s243_s2 }
  0x47   :  { %p168_p9 = pnand %p166_p8, %p163_p7 }
  0x49   :  { %171 = shalt.err (!%p168_p9)
}
  0x4a   :  { %93 = dma.vmem_to_hbm [thread:$0]  %s88_s7, 64, %s243_s2, [#allocation4], %s179_s20, %s179_s20, %s180_s21  }
  0x4b   :  { %176 = dma.done.wait [#allocation4], 256  }
  0x4c   :  { %177 = vsyncadd [#allocation4], 4294967040 }
  0x4d   :  { %97 = vsyncpa [#allocation3], 1 }
  0x4e   :  { %98 = vsyncpa [#allocation6], 1 }
  0x4f   :  { %99 = vsyncpa [#allocation4], 1 }

</bundles_post_ra>
